<compile_context>
chip_gen: v5e
topology: v5e:2x2
jax: 0.10.0
libtpu: 0.0.40
codegen_flags: <defaults>
</compile_context>

<pallas_src>
import functools
import math

import jax
import jax.numpy as jnp
from jax.experimental import pallas as pl
from jax.experimental.pallas import tpu as pltpu

IN_DIM, L1, L2, OUT_DIM = 100, 120, 84, 3
L1_PAD, L2_PAD, OUT_PAD = 128, 128, 8  # lane-padded hidden widths / narrow out


def _round_up(n: int, m: int) -> int:
    return ((n + m - 1) // m) * m


def _forward_core(x, w1, b1, w2, b2, w3, b3, drop_mult=None):
    """Fused forward: matmuls in (possibly) bf16 on the MXU with f32
    accumulation; ReLU / dropout scale / sigmoid in f32."""
    dt = w1.dtype
    h = jnp.dot(x.astype(dt), w1, preferred_element_type=jnp.float32) + b1
    h = jnp.maximum(h, 0.0)                                   # ReLU
    h = jnp.dot(h.astype(dt), w2, preferred_element_type=jnp.float32) + b2
    h = jnp.maximum(h, 0.0)                                   # ReLU
    if drop_mult is not None:                                 # inverted dropout
        h = h * drop_mult
    o = jnp.dot(h.astype(dt), w3, preferred_element_type=jnp.float32) + b3
    return jax.nn.sigmoid(o)                                  # Sigmoid


def _mlp_kernel_eval(x_ref, w1_ref, b1_ref, w2_ref, b2_ref, w3_ref, b3_ref,
                     o_ref):
    o_ref[...] = _forward_core(
        x_ref[...], w1_ref[...], b1_ref[...], w2_ref[...], b2_ref[...],
        w3_ref[...], b3_ref[...]).astype(o_ref.dtype)


def _mlp_kernel_train(x_ref, m_ref, w1_ref, b1_ref, w2_ref, b2_ref, w3_ref,
                      b3_ref, o_ref):
    o_ref[...] = _forward_core(
        x_ref[...], w1_ref[...], b1_ref[...], w2_ref[...], b2_ref[...],
        w3_ref[...], b3_ref[...], drop_mult=m_ref[...]).astype(o_ref.dtype)


def init_params(key, l1=L1, l2=L2, in_dim=IN_DIM, out_dim=OUT_DIM,
                dtype=jnp.float32):
    """PyTorch nn.Linear-style init: U[-1/sqrt(fan_in), +1/sqrt(fan_in)]."""
    keys = jax.random.split(key, 6)

    def linear(kw, kb, fan_in, fan_out):
        bound = 1.0 / math.sqrt(fan_in)
        w = jax.random.uniform(kw, (fan_in, fan_out), dtype, -bound, bound)
        b = jax.random.uniform(kb, (1, fan_out), dtype, -bound, bound)
        return w, b

    w1, b1 = linear(keys[0], keys[1], in_dim, l1)
    w2, b2 = linear(keys[2], keys[3], l1, l2)
    w3, b3 = linear(keys[4], keys[5], l2, out_dim)
    return dict(w1=w1, b1=b1, w2=w2, b2=b2, w3=w3, b3=b3)


def _pad2(a, rows, cols):
    r, c = a.shape
    return jnp.pad(a, ((0, rows - r), (0, cols - c)))


@functools.partial(jax.jit,
                   static_argnames=("p", "training", "tb", "use_bf16"))
def mlp_nn_rank(x, params, key=None, *, p=0.2, training=False, tb=1024,
                use_bf16=True):
    """Fused MLPNNRank forward. x: (B, 100) f32 -> (B, 3) f32."""
    B, in_dim = x.shape
    assert in_dim == IN_DIM, f"expected {IN_DIM} input features, got {in_dim}"
    if training and p > 0.0 and key is None:
        raise ValueError("training=True with p>0 requires a PRNG `key`")

    mxu_dtype = jnp.bfloat16 if use_bf16 else jnp.float32

    # Pad only non-contraction weight dims (padded cols/rows/biases are 0, so
    # padded lanes stay exactly 0 through ReLU/dropout and never leak).
    w1 = _pad2(params["w1"], IN_DIM, L1_PAD).astype(mxu_dtype)   # (100, 128)
    b1 = _pad2(params["b1"], 1, L1_PAD).astype(jnp.float32)
    w2 = _pad2(params["w2"], L1_PAD, L2_PAD).astype(mxu_dtype)   # (128, 128)
    b2 = _pad2(params["b2"], 1, L2_PAD).astype(jnp.float32)
    w3 = _pad2(params["w3"], L2_PAD, OUT_PAD).astype(mxu_dtype)  # (128, 8)
    b3 = _pad2(params["b3"], 1, OUT_PAD).astype(jnp.float32)

    # Batch tiling: large tile amortizes ~0.35us/step; batch padded only when
    # it is not already a tile multiple (padded rows sliced off below).
    block = _round_up(min(tb, _round_up(B, 8)), 8)
    b_pad = _round_up(B, block)
    xp = x if b_pad == B else jnp.pad(x, ((0, b_pad - B), (0, 0)))

    grid = (b_pad // block,)
    resident = lambda r, c: pl.BlockSpec((r, c), lambda i: (0, 0))
    weight_specs = [
        resident(IN_DIM, L1_PAD), resident(1, L1_PAD),
        resident(L1_PAD, L2_PAD), resident(1, L2_PAD),
        resident(L2_PAD, OUT_PAD), resident(1, OUT_PAD),
    ]
    x_spec = pl.BlockSpec((block, IN_DIM), lambda i: (i, 0))
    o_spec = pl.BlockSpec((block, OUT_PAD), lambda i: (i, 0))

    weight_bytes = sum(int(a.size) * a.dtype.itemsize
                       for a in (w1, b1, w2, b2, w3, b3))
    extra_bytes = 0

    if training and p > 0.0:
        # Inverted dropout multiplier generated outside the kernel with
        # jax.random (portable).  RNG stream differs from PyTorch.
        if p >= 1.0:
            mult = jnp.zeros((b_pad, L2_PAD), jnp.float32)
        else:
            keep = jax.random.bernoulli(key, 1.0 - p, (b_pad, L2_PAD))
            mult = keep.astype(jnp.float32) * (1.0 / (1.0 - p))
        kernel = _mlp_kernel_train
        in_specs = [x_spec, pl.BlockSpec((block, L2_PAD), lambda i: (i, 0))]
        in_specs += weight_specs
        args = (xp, mult, w1, b1, w2, b2, w3, b3)
        extra_bytes = int(mult.size) * mult.dtype.itemsize
    else:
        kernel = _mlp_kernel_eval
        in_specs = [x_spec] + weight_specs
        args = (xp, w1, b1, w2, b2, w3, b3)

    cost = pl.CostEstimate(
        flops=2 * b_pad * (IN_DIM * L1_PAD + L1_PAD * L2_PAD + L2_PAD * OUT_PAD),
        transcendentals=b_pad * OUT_PAD,
        bytes_accessed=int(xp.size) * xp.dtype.itemsize
        + b_pad * OUT_PAD * 4 + weight_bytes + extra_bytes,
    )

    out_pad = pl.pallas_call(
        kernel,
        out_shape=jax.ShapeDtypeStruct((b_pad, OUT_PAD), jnp.float32),
        grid=grid,
        in_specs=in_specs,
        out_specs=o_spec,
        compiler_params=pltpu.CompilerParams(
            dimension_semantics=("parallel",)),
        cost_estimate=cost,
    )(*args)

    return out_pad[:B, :OUT_DIM]


def _reference(x, params, use_bf16=True):
    """Pure-JAX reference (eval mode) using the same MXU operand dtype."""
    dt = jnp.bfloat16 if use_bf16 else jnp.float32

    def dot(a, w):
        return jnp.dot(a.astype(dt), w.astype(dt),
                       preferred_element_type=jnp.float32)

    h = jax.nn.relu(dot(x, params["w1"]) + params["b1"])
    h = jax.nn.relu(dot(h, params["w2"]) + params["b2"])
    o = dot(h, params["w3"]) + params["b3"]
    return jax.nn.sigmoid(o)


if __name__ == "__main__":
    key = jax.random.PRNGKey(0)
    k_param, k_x, k_drop = jax.random.split(key, 3)

    B = 16  # small example batch
    params = init_params(k_param)
    x = jax.random.normal(k_x, (B, IN_DIM), dtype=jnp.float32)

    # Eval-mode forward (dropout = identity), matching module.eval() semantics.
    out = mlp_nn_rank(x, params, p=0.2, training=False)
    out = jax.block_until_ready(out)

    ref = _reference(x, params, use_bf16=True)
    assert out.shape == (B, OUT_DIM), out.shape
    assert bool(jnp.all(jnp.isfinite(out)))
    assert jnp.allclose(out, ref, atol=2e-3, rtol=2e-3), "mismatch vs reference"

    # Training-mode forward (inverted dropout).
    # TODO(synk): dropout RNG stream differs from PyTorch (jax.random mask).
    out_train = mlp_nn_rank(x, params, k_drop, p=0.2, training=True)
    out_train = jax.block_until_ready(out_train)
    assert out_train.shape == (B, OUT_DIM)
    assert bool(jnp.all((out_train >= 0.0) & (out_train <= 1.0)))

    print("KERNEL_OK")
</pallas_src>

<mosaic_0001>
module attributes {stable_mosaic.version = 11 : i64} {
  func.func @_mlp_kernel_eval(%arg0: i32, %arg1: memref<16x100xf32, #tpu.memory_space<vmem>>, %arg2: memref<100x128xbf16, #tpu.memory_space<vmem>>, %arg3: memref<1x128xf32, #tpu.memory_space<vmem>>, %arg4: memref<128x128xbf16, #tpu.memory_space<vmem>>, %arg5: memref<1x128xf32, #tpu.memory_space<vmem>>, %arg6: memref<128x8xbf16, #tpu.memory_space<vmem>>, %arg7: memref<1x8xf32, #tpu.memory_space<vmem>>, %arg8: memref<16x8xf32, #tpu.memory_space<vmem>>) attributes {dimension_semantics = [#tpu.dimension_semantics<parallel>], iteration_bounds = array<i64: 1>, scalar_prefetch = 0 : i64, scratch_operands = 0 : i64, tpu.core_type = #tpu.core_type<tc>, window_params = [{transform_indices = @transform_0, window_bounds = array<i64: 16, 100>}, {pipeline_mode = #tpu.pipeline_mode<synchronous>, transform_indices = @transform_1, window_bounds = array<i64: 100, 128>}, {pipeline_mode = #tpu.pipeline_mode<synchronous>, transform_indices = @transform_2, window_bounds = array<i64: 1, 128>}, {pipeline_mode = #tpu.pipeline_mode<synchronous>, transform_indices = @transform_3, window_bounds = array<i64: 128, 128>}, {pipeline_mode = #tpu.pipeline_mode<synchronous>, transform_indices = @transform_4, window_bounds = array<i64: 1, 128>}, {pipeline_mode = #tpu.pipeline_mode<synchronous>, transform_indices = @transform_5, window_bounds = array<i64: 128, 8>}, {pipeline_mode = #tpu.pipeline_mode<synchronous>, transform_indices = @transform_6, window_bounds = array<i64: 1, 8>}, {transform_indices = @transform_7, window_bounds = array<i64: 16, 8>}]} {
    %c0 = arith.constant 0 : index
    %c0_0 = arith.constant 0 : index
    %0 = vector.load %arg1[%c0, %c0_0] : memref<16x100xf32, #tpu.memory_space<vmem>>, vector<16x100xf32>
    %c0_1 = arith.constant 0 : index
    %c0_2 = arith.constant 0 : index
    %1 = vector.load %arg2[%c0_1, %c0_2] : memref<100x128xbf16, #tpu.memory_space<vmem>>, vector<100x128xbf16>
    %c0_3 = arith.constant 0 : index
    %c0_4 = arith.constant 0 : index
    %2 = vector.load %arg3[%c0_3, %c0_4] : memref<1x128xf32, #tpu.memory_space<vmem>>, vector<1x128xf32>
    %c0_5 = arith.constant 0 : index
    %c0_6 = arith.constant 0 : index
    %3 = vector.load %arg4[%c0_5, %c0_6] : memref<128x128xbf16, #tpu.memory_space<vmem>>, vector<128x128xbf16>
    %c0_7 = arith.constant 0 : index
    %c0_8 = arith.constant 0 : index
    %4 = vector.load %arg5[%c0_7, %c0_8] : memref<1x128xf32, #tpu.memory_space<vmem>>, vector<1x128xf32>
    %c0_9 = arith.constant 0 : index
    %c0_10 = arith.constant 0 : index
    %5 = vector.load %arg6[%c0_9, %c0_10] : memref<128x8xbf16, #tpu.memory_space<vmem>>, vector<128x8xbf16>
    %c0_11 = arith.constant 0 : index
    %c0_12 = arith.constant 0 : index
    %6 = vector.load %arg7[%c0_11, %c0_12] : memref<1x8xf32, #tpu.memory_space<vmem>>, vector<1x8xf32>
    %7 = arith.truncf %0 : vector<16x100xf32> to vector<16x100xbf16>
    %cst = arith.constant dense<0.000000e+00> : vector<16x128xf32>
    %8 = tpu.matmul %7, %1, %cst {dimension_numbers = #tpu.dot_dimension_numbers<[1], [0], [0], [1], [0, 0, 1, 1], [], []>} : vector<16x100xbf16>, vector<100x128xbf16>, vector<16x128xf32> -> vector<16x128xf32>
    %9 = vector.broadcast %2 : vector<1x128xf32> to vector<16x128xf32>
    %10 = arith.addf %8, %9 : vector<16x128xf32>
    %cst_13 = arith.constant 0.000000e+00 : f32
    %11 = vector.broadcast %cst_13 : f32 to vector<16x128xf32>
    %12 = arith.maximumf %10, %11 : vector<16x128xf32>
    %13 = arith.truncf %12 : vector<16x128xf32> to vector<16x128xbf16>
    %cst_14 = arith.constant dense<0.000000e+00> : vector<16x128xf32>
    %14 = tpu.matmul %13, %3, %cst_14 {dimension_numbers = #tpu.dot_dimension_numbers<[1], [0], [0], [1], [0, 0, 1, 1], [], []>} : vector<16x128xbf16>, vector<128x128xbf16>, vector<16x128xf32> -> vector<16x128xf32>
    %15 = vector.broadcast %4 : vector<1x128xf32> to vector<16x128xf32>
    %16 = arith.addf %14, %15 : vector<16x128xf32>
    %cst_15 = arith.constant 0.000000e+00 : f32
    %17 = vector.broadcast %cst_15 : f32 to vector<16x128xf32>
    %18 = arith.maximumf %16, %17 : vector<16x128xf32>
    %19 = arith.truncf %18 : vector<16x128xf32> to vector<16x128xbf16>
    %cst_16 = arith.constant dense<0.000000e+00> : vector<16x8xf32>
    %20 = tpu.matmul %19, %5, %cst_16 {dimension_numbers = #tpu.dot_dimension_numbers<[1], [0], [0], [1], [0, 0, 1, 1], [], []>} : vector<16x128xbf16>, vector<128x8xbf16>, vector<16x8xf32> -> vector<16x8xf32>
    %21 = vector.broadcast %6 : vector<1x8xf32> to vector<16x8xf32>
    %22 = arith.addf %20, %21 : vector<16x8xf32>
    %23 = arith.negf %22 : vector<16x8xf32>
    %24 = math.exp %23 : vector<16x8xf32>
    %cst_17 = arith.constant 1.000000e+00 : f32
    %25 = vector.broadcast %cst_17 : f32 to vector<16x8xf32>
    %26 = arith.addf %25, %24 : vector<16x8xf32>
    %27 = arith.divf %25, %26 : vector<16x8xf32>
    %c0_18 = arith.constant 0 : index
    %c0_19 = arith.constant 0 : index
    %28 = vector.load %arg8[%c0_18, %c0_19] : memref<16x8xf32, #tpu.memory_space<vmem>>, vector<16x8xf32>
    tpu.vector_store %arg8[%c0_18, %c0_19], %27 {strides = array<i32>} : memref<16x8xf32, #tpu.memory_space<vmem>>, vector<16x8xf32>,
    return
  }
  func.func @transform_0(%arg0: i32) -> (i32, i32) {
    %c0_i32 = arith.constant 0 : i32
    %c0_i32_0 = arith.constant 0 : i32
    return %arg0, %c0_i32 : i32, i32
  }
  func.func @transform_1(%arg0: i32) -> (i32, i32) {
    %c0_i32 = arith.constant 0 : i32
    %c0_i32_0 = arith.constant 0 : i32
    %c0_i32_1 = arith.constant 0 : i32
    return %c0_i32, %c0_i32_0 : i32, i32
  }
  func.func @transform_2(%arg0: i32) -> (i32, i32) {
    %c0_i32 = arith.constant 0 : i32
    %c0_i32_0 = arith.constant 0 : i32
    %c0_i32_1 = arith.constant 0 : i32
    return %c0_i32, %c0_i32_0 : i32, i32
  }
  func.func @transform_3(%arg0: i32) -> (i32, i32) {
    %c0_i32 = arith.constant 0 : i32
    %c0_i32_0 = arith.constant 0 : i32
    %c0_i32_1 = arith.constant 0 : i32
    return %c0_i32, %c0_i32_0 : i32, i32
  }
  func.func @transform_4(%arg0: i32) -> (i32, i32) {
    %c0_i32 = arith.constant 0 : i32
    %c0_i32_0 = arith.constant 0 : i32
    %c0_i32_1 = arith.constant 0 : i32
    return %c0_i32, %c0_i32_0 : i32, i32
  }
  func.func @transform_5(%arg0: i32) -> (i32, i32) {
    %c0_i32 = arith.constant 0 : i32
    %c0_i32_0 = arith.constant 0 : i32
    %c0_i32_1 = arith.constant 0 : i32
    return %c0_i32, %c0_i32_0 : i32, i32
  }
  func.func @transform_6(%arg0: i32) -> (i32, i32) {
    %c0_i32 = arith.constant 0 : i32
    %c0_i32_0 = arith.constant 0 : i32
    %c0_i32_1 = arith.constant 0 : i32
    return %c0_i32, %c0_i32_0 : i32, i32
  }
  func.func @transform_7(%arg0: i32) -> (i32, i32) {
    %c0_i32 = arith.constant 0 : i32
    %c0_i32_0 = arith.constant 0 : i32
    return %arg0, %c0_i32 : i32, i32
  }
}

</mosaic_0001>

<bundles_post_ra>
// kernel: mlp_nn_rank.1
= control target key start
LH: loop header
LB: loop body
LE: loop exit
PB: predicated region body
PF: predicated region fallthrough
CT: control target
= control target key end

     0   :  { %vm124_vm0 = vcmask 1041408   ;;  %vm120_vm1 = vcmask 818176   ;;  %vm316_vm5 = vcmask 64512   ;;  %s579_s1 = inlined_call_operand.vmem [shape: bf16[100,128], index: 1, kind: input, shape index: {}]   ;;  %s580_s3 = inlined_call_operand.vmem [shape: bf16[128,128], index: 3, kind: input, shape index: {}]   ;;  %s581_s2 = inlined_call_operand.vmem [shape: f32[1,128], index: 2, kind: input, shape index: {}]   ;;  %s582_s0 = inlined_call_operand.vmem [shape: f32[16,100], index: 0, kind: input, shape index: {}]   ;;  %s583_s4 = inlined_call_operand.vmem [shape: f32[1,128], index: 4, kind: input, shape index: {}]   ;;  %s584_s5 = inlined_call_operand.vmem [shape: bf16[128,8], index: 5, kind: input, shape index: {}]   ;;  %s585_s6 = inlined_call_operand.vmem [shape: f32[1,8], index: 6, kind: input, shape index: {}]   ;;  %s586_s7 = inlined_call_operand.vmem [shape: f32[16,8], index: 7, kind: output, shape index: {}]  }
   0x1   :  { %v41_v0 = vld [vmem:[%s579_s1 + $0x30] sm:$0x3]  ;;  %v427_v3 = vld [vmem:[%s580_s3 + $0x38] sm:$0xff]  ;;  %v419_v6 = vld [vmem:[%s579_s1 + $0x28] sm:$0xff] }
   0x2   :  { %v106_v1 = vunpack.c.l.b16 %v41_v0  ;;  %196 = vmatpush.bf16.msra.mxu1 %v427_v3  ;;  %v426_v5 = vld [vmem:[%s580_s3 + $0x30] sm:$0xff]  ;;  %v425_v7 = vld [vmem:[%s580_s3 + $0x28] sm:$0xff]  ;;  %v418_v8 = vld [vmem:[%s579_s1 + $0x20] sm:$0xff] }
   0x3   :  { %v424_v9 = vld [vmem:[%s580_s3 + $0x20] sm:$0xff]  ;;  %v417_v10 = vld [vmem:[%s579_s1 + $0x18] sm:$0xff]  ;;  %v416_v11 = vld [vmem:[%s579_s1 + $0x10] sm:$0xff] }
   0x4   :  { %v113_v2 = vpack.c.b16 %v106_v1, %v106_v1  ;;  %v415_v12 = vld [vmem:[%s579_s1 + $0x8] sm:$0xff]  ;;  %v414_v13 = vld [vmem:[%s579_s1] sm:$0xff]  ;;  %v423_v17 = vld [vmem:[%s580_s3 + $0x18] sm:$0xff] }
   0x5   :  { %v27_v14 = vld [vmem:[%s582_s0] sm:$0xff]  ;;  %v28_v15 = vld [vmem:[%s582_s0 + $0x8] sm:$0xff]  ;;  %v422_v18 = vld [vmem:[%s580_s3 + $0x10] sm:$0xff] }
   0x6   :  { %v126_v4 = vsel %vm124_vm0, %v113_v2, 0  ;;  %197 = vmatpush.bf16.msra.mxu1 %v426_v5  ;;  %v77_v16 = vpack.c.bf16 %v28_v15, %v27_v14  ;;  %v421_v19 = vld [vmem:[%s580_s3 + $0x8] sm:$0xff]  ;;  %v420_v20 = vld [vmem:[%s580_s3] sm:$0xff]  ;;  %v435_v21 = vld [vmem:[%s584_s5 + $0x38] sm:$0xff] }
   0x7   :  { %129 = vmatpush.bf16.msra.mxu0 %v126_v4  ;;  %264 = vmatpush.bf16.msra.mxu2 %v435_v21  ;;  %v434_v22 = vld [vmem:[%s584_s5 + $0x30] sm:$0xff]  ;;  %v433_v23 = vld [vmem:[%s584_s5 + $0x28] sm:$0xff]  ;;  %v432_v24 = vld [vmem:[%s584_s5 + $0x20] sm:$0xff] }
   0x8   :  { %v436_v26 = vld [vmem:[%s581_s2] ss:$0 sm:$0xff]  ;;  %v431_v33 = vld [vmem:[%s584_s5 + $0x18] sm:$0xff]  ;;  %v430_v34 = vld [vmem:[%s584_s5 + $0x10] sm:$0xff] }
   0x9   :  { %v429_v35 = vld [vmem:[%s584_s5 + $0x8] sm:$0xff]  ;;  %v428_v36 = vld [vmem:[%s584_s5] sm:$0xff] }
   0xa   :  { %198 = vmatpush.bf16.msra.mxu1 %v425_v7  ;;  %v437_v38 = vld [vmem:[%s583_s4] ss:$0 sm:$0xff] }
   0xb   :  { %130 = vmatpush.bf16.msra.mxu0 %v419_v6  ;;  %265 = vmatpush.bf16.msra.mxu2 %v434_v22  ;;  %v438_v45 = vld [vmem:[%s585_s6] ss:$0 sm:$0xff] }
   0xe   :  { %199 = vmatpush.bf16.msra.mxu1 %v424_v9 }
   0xf   :  { %131 = vmatpush.bf16.msra.mxu0 %v418_v8  ;;  %266 = vmatpush.bf16.msra.mxu2 %v433_v23 }
  0x12   :  { %200 = vmatpush.bf16.msra.mxu1 %v423_v17 }
  0x13   :  { %132 = vmatpush.bf16.msra.mxu0 %v417_v10  ;;  %267 = vmatpush.bf16.msra.mxu2 %v432_v24 }
  0x16   :  { %201 = vmatpush.bf16.msra.mxu1 %v422_v18 }
  0x17   :  { %133 = vmatpush.bf16.msra.mxu0 %v416_v11  ;;  %268 = vmatpush.bf16.msra.mxu2 %v431_v33 }
  0x1a   :  { %202 = vmatpush.bf16.msra.mxu1 %v421_v19 }
  0x1b   :  { %134 = vmatpush.bf16.msra.mxu0 %v415_v12  ;;  %269 = vmatpush.bf16.msra.mxu2 %v430_v34 }
  0x1e   :  { %203 = vmatpush.bf16.msra.mxu1 %v420_v20 }
  0x1f   :  { %135 = vmatpush.bf16.msra.mxu0 %v414_v13  ;;  %270 = vmatpush.bf16.msra.mxu2 %v429_v35 }
  0x22   :  { %347 = vmatmul.msk.bf16.vlgmr.msra.gmra.mxu0 %vm120_vm1, %v77_v16 }
  0x23   :  { %271 = vmatpush.bf16.msra.mxu2 %v428_v36 }
  0x9f   :  { %v137_v25 = vpop.f32.mrf.mxu0 }
  0xa0   :  { %v138_v27 = vadd.f32 %v436_v26, %v137_v25 }
  0xa2   :  { %v142_v30 = vmax.f32 %v138_v27, 0.0 }
  0xa7   :  { %v139_v28 = vpop.f32.mrf.mxu0 }
  0xa8   :  { %v140_v29 = vadd.f32 %v436_v26, %v139_v28 }
  0xaa   :  { %v143_v31 = vmax.f32 %v140_v29, 0.0 }
  0xac   :  { %v144_v32 = vpack.c.bf16 %v143_v31, %v142_v30 }
  0xae   :  { %204 = vmatmul.bf16.vlgmr.msra.gmra.mxu1 %v144_v32 }
 0x12b   :  { %v205_v37 = vpop.f32.mrf.mxu1 }
 0x12c   :  { %v206_v39 = vadd.f32 %v437_v38, %v205_v37 }
 0x12e   :  { %v210_v42 = vmax.f32 %v206_v39, 0.0 }
 0x133   :  { %v207_v40 = vpop.f32.mrf.mxu1 }
 0x134   :  { %v208_v41 = vadd.f32 %v437_v38, %v207_v40 }
 0x136   :  { %v211_v43 = vmax.f32 %v208_v41, 0.0 }
 0x138   :  { %v212_v44 = vpack.c.bf16 %v211_v43, %v210_v42 }
 0x13a   :  { %272 = vmatmul.bf16.vlgmr.msra.gmra.mxu2 %v212_v44 }
 0x1bd   :  { %v273_v46 = vpop.f32.mrf.mxu2 }
 0x1be   :  { %v274_v47 = vadd.f32 %v438_v45, %v273_v46 }
 0x1c0   :  { %v412_v48 = vmul.f32 -1.442695, %v274_v47 }
 0x1c2   :  { %439 = vpow2.f32 %v412_v48 }
 0x1c5   :  { %v275_v49 = vpop.f32.mrf.mxu2 }
 0x1c6   :  { %v276_v50 = vadd.f32 %v438_v45, %v275_v49 }
 0x1c8   :  { %v440_v51 = vpop.eup %439  ;;  %v413_v52 = vmul.f32 -1.442695, %v276_v50 }
 0x1c9   :  { %v284_v53 = vadd.f32 1.0, %v440_v51 }
 0x1ca   :  { %441 = vpow2.f32 %v413_v52 }
 0x1cb   :  { %443 = vrcp.f32 %v284_v53  ;;  %v297_v59 = vand.u32 2147483648, %v284_v53  ;;  %v295_v61 = vand.u32 2147483647, %v284_v53  ;;  %vm291_vm3 = vweird.f32 %v284_v53 }
 0x1cd   :  { %v298_v0 = vor.u32 1.1754944e-38, %v297_v59  ;;  %vm296_vm6 = vcmp.eq.f32.partialorder %v295_v61, 8.507059e+37 }
 0x1d0   :  { %v442_v54 = vpop.eup %441 }
 0x1d1   :  { %v444_v55 = vpop.eup %443  ;;  %v285_v56 = vadd.f32 1.0, %v442_v54 }
 0x1d2   :  { %v287_v57 = vmul.f32 %v444_v55, %v284_v53  ;;  %vm292_vm2 = vweird.f32 %v444_v55 }
 0x1d3   :  { %445 = vrcp.f32 %v285_v56  ;;  %vm293_vm4 = vmor %vm291_vm3, %vm292_vm2  ;;  %v312_v5 = vand.u32 2147483648, %v285_v56  ;;  %v310_v7 = vand.u32 2147483647, %v285_v56  ;;  %vm306_vm8 = vweird.f32 %v285_v56 }
 0x1d4   :  { %v288_v58 = vsub.f32 1.0, %v287_v57 }
 0x1d5   :  { %v313_v9 = vor.u32 1.1754944e-38, %v312_v5  ;;  %vm311_vm10 = vcmp.eq.f32.partialorder %v310_v7, 8.507059e+37 }
 0x1d6   :  { %v289_v60 = vmul.f32 %v444_v55, %v288_v58 }
 0x1d8   :  { %v290_v62 = vadd.f32 %v444_v55, %v289_v60 }
 0x1d9   :  { %v446_v63 = vpop.eup %445 }
 0x1da   :  { %v294_v1 = vsel %vm293_vm4, %v444_v55, %v290_v62  ;;  %v302_v2 = vmul.f32 %v446_v63, %v285_v56  ;;  %vm307_vm7 = vweird.f32 %v446_v63 }
 0x1db   :  { %v299_v3 = vsel %vm296_vm6, %v298_v0, %v294_v1  ;;  %vm308_vm9 = vmor %vm306_vm8, %vm307_vm7 }
 0x1dc   :  { %317 = vst.msk [vmem:[%s586_s7] sm:$0xff] %vm316_vm5, %v299_v3  ;;  %v303_v4 = vsub.f32 1.0, %v302_v2 }
 0x1de   :  { %v304_v6 = vmul.f32 %v446_v63, %v303_v4 }
 0x1e0   :  { %v305_v8 = vadd.f32 %v446_v63, %v304_v6 }
 0x1e2   :  { %v309_v10 = vsel %vm308_vm9, %v446_v63, %v305_v8 }
 0x1e3   :  { %v314_v11 = vsel %vm311_vm10, %v313_v9, %v309_v10 }
 0x1e4   :  { %318 = vst.msk [vmem:[%s586_s7 + $0x8] sm:$0xff] %vm316_vm5, %v314_v11 }

</bundles_post_ra>
